<compile_context>
chip_gen: v6e
topology: v6e:2x2x1
jax: 0.10.0
libtpu: 0.0.40
codegen_flags: <defaults>
</compile_context>

<pallas_src>
import functools

import jax
import jax.numpy as jnp
from jax.experimental import pallas as pl
from jax.experimental.pallas import tpu as pltpu


def _round_up(x, m):
    return ((x + m - 1) // m) * m


def _ffn_kernel(x_ref, w1_ref, b1_ref, w2_ref, b2_ref, o_ref, acc_ref):
    # x_ref:  (tm, E)  bf16      w1_ref: (E, tf) bf16   b1_ref: (1, tf) f32
    # w2_ref: (tf, E)  bf16      b2_ref: (1, E)  f32
    # o_ref:  (tm, E)  out dtype acc_ref: (tm, E) f32 scratch (resident over k)
    k = pl.program_id(1)

    @pl.when(k == 0)
    def _():
        # Fold the second bias into the accumulator init (saves a VPU pass).
        acc_ref[...] = jnp.broadcast_to(b2_ref[...], acc_ref.shape)

    # First matmul on this F slab: (tm, E) @ (E, tf) -> (tm, tf), f32 acc.
    h = jnp.dot(x_ref[...], w1_ref[...], preferred_element_type=jnp.float32)
    h = jnp.maximum(h + b1_ref[...], 0.0)          # bias + ReLU
    # TODO(synk): dropout is identity here (inference mode); training-mode
    # dropout would mask `h` using pltpu.prng_seed / pltpu.prng_random_bits.

    # Second matmul: accumulate this slab's (tm, E) contribution in f32.
    acc_ref[...] += jnp.dot(h.astype(w2_ref.dtype), w2_ref[...],
                            preferred_element_type=jnp.float32)

    @pl.when(k == pl.num_programs(1) - 1)
    def _():
        o_ref[...] = acc_ref[...].astype(o_ref.dtype)


@functools.partial(jax.jit, static_argnames=("tm", "tf"))
def feed_forward(x, w1, b1, w2, b2, *, tm=256, tf=512):
    """x: (B, S, E). Weights stored transposed vs torch: w1: (E, F), w2: (F, E).
    Returns (B, S, E)."""
    B, S, E = x.shape
    Ein, F = w1.shape
    assert Ein == E and w2.shape == (F, E)
    M = B * S

    # Lane-dense padding: last dims to multiples of 128; rows to the row tile.
    E_pad = _round_up(E, 128)
    tf_eff = min(tf, _round_up(F, 128))            # F-slab size (multiple of 128)
    F_pad = _round_up(F, tf_eff)
    tm_eff = min(tm, _round_up(M, 16))             # adaptive row tile (mult of 16)
    M_pad = _round_up(M, tm_eff)

    compute_dtype = jnp.bfloat16                   # MXU operands

    x2d = jnp.pad(x.reshape(M, E),
                  ((0, M_pad - M), (0, E_pad - E))).astype(compute_dtype)
    w1p = jnp.pad(w1, ((0, E_pad - E), (0, F_pad - F))).astype(compute_dtype)
    w2p = jnp.pad(w2, ((0, F_pad - F), (0, E_pad - E))).astype(compute_dtype)
    b1p = jnp.pad(b1, (0, F_pad - F)).astype(jnp.float32).reshape(1, F_pad)
    b2p = jnp.pad(b2, (0, E_pad - E)).astype(jnp.float32).reshape(1, E_pad)

    grid = (M_pad // tm_eff, F_pad // tf_eff)

    # VMEM budget: double-buffered streamed tiles + f32 accumulator.
    vmem_needed = (2 * tm_eff * E_pad * 2          # x tile (bf16)
                   + 2 * E_pad * tf_eff * 2        # W1 slab (bf16)
                   + 2 * tf_eff * E_pad * 2        # W2 slab (bf16)
                   + 2 * (tf_eff + E_pad) * 4      # biases (f32)
                   + 2 * tm_eff * E_pad * 4        # output tile (f32)
                   + tm_eff * E_pad * 4)           # accumulator scratch (f32)
    vmem_limit = int(min(100 * 2**20, max(32 * 2**20, 2 * vmem_needed)))

    flops = 4 * M_pad * E_pad * F_pad              # two matmuls
    bytes_accessed = (x2d.size * 2 + w1p.size * 2 + w2p.size * 2
                      + (b1p.size + b2p.size) * 4
                      + M_pad * E_pad * x.dtype.itemsize)

    out2d = pl.pallas_call(
        _ffn_kernel,
        out_shape=jax.ShapeDtypeStruct((M_pad, E_pad), x.dtype),
        grid_spec=pltpu.PrefetchScalarGridSpec(
            num_scalar_prefetch=0,
            grid=grid,
            in_specs=[
                pl.BlockSpec((tm_eff, E_pad), lambda i, k: (i, 0)),   # x rows
                pl.BlockSpec((E_pad, tf_eff), lambda i, k: (0, k)),   # W1 slab
                pl.BlockSpec((1, tf_eff), lambda i, k: (0, k)),       # b1 slab
                pl.BlockSpec((tf_eff, E_pad), lambda i, k: (k, 0)),   # W2 slab
                pl.BlockSpec((1, E_pad), lambda i, k: (0, 0)),        # b2
            ],
            out_specs=pl.BlockSpec((tm_eff, E_pad), lambda i, k: (i, 0)),
            scratch_shapes=[pltpu.VMEM((tm_eff, E_pad), jnp.float32)],
        ),
        compiler_params=pltpu.CompilerParams(
            dimension_semantics=("parallel", "arbitrary"),
            vmem_limit_bytes=vmem_limit),
        cost_estimate=pl.CostEstimate(
            flops=flops, transcendentals=0, bytes_accessed=bytes_accessed),
    )(x2d, w1p, b1p, w2p, b2p)

    return out2d[:M, :E].reshape(B, S, E)


def _init_linear(key, fan_in, fan_out, dtype=jnp.float32):
    """Deterministic init mimicking torch.nn.Linear (uniform +/- 1/sqrt(fan_in)).
       Returns weight already transposed to (fan_in, fan_out)."""
    kw, kb = jax.random.split(key)
    bound = 1.0 / (fan_in ** 0.5)
    w = jax.random.uniform(kw, (fan_in, fan_out), dtype, -bound, bound)
    b = jax.random.uniform(kb, (fan_out,), dtype, -bound, bound)
    return w, b


if __name__ == "__main__":
    key = jax.random.PRNGKey(0)
    k_x, k_l1, k_l2 = jax.random.split(key, 3)

    batch, seq, embed_dim, ff_dim = 2, 8, 32, 64

    x = jax.random.normal(k_x, (batch, seq, embed_dim), jnp.float32)
    w1, b1 = _init_linear(k_l1, embed_dim, ff_dim)    # ff_1: E -> F
    w2, b2 = _init_linear(k_l2, ff_dim, embed_dim)    # ff_2: F -> E

    out = feed_forward(x, w1, b1, w2, b2)
    out = jax.block_until_ready(out)
    assert out.shape == (batch, seq, embed_dim)

    # Reference 1: same math as the kernel (bf16 MXU operands, f32 accumulate).
    xb = x.astype(jnp.bfloat16)
    h_ref = jnp.maximum(
        jnp.dot(xb, w1.astype(jnp.bfloat16),
                preferred_element_type=jnp.float32) + b1, 0.0)
    ref_bf16 = jnp.dot(h_ref.astype(jnp.bfloat16), w2.astype(jnp.bfloat16),
                       preferred_element_type=jnp.float32) + b2
    assert jnp.allclose(out, ref_bf16, atol=2e-3, rtol=2e-3)

    # Reference 2: full-precision semantics check (bf16 rounding tolerance).
    ref_f32 = jnp.maximum(x @ w1 + b1, 0.0) @ w2 + b2
    assert jnp.allclose(out, ref_f32, atol=5e-2, rtol=5e-2)

    print("KERNEL_OK")
</pallas_src>

<mosaic_0001>
module attributes {stable_mosaic.version = 11 : i64} {
  func.func @_ffn_kernel(%arg0: i32, %arg1: i32, %arg2: memref<16x128xbf16, #tpu.memory_space<vmem>>, %arg3: memref<128x128xbf16, #tpu.memory_space<vmem>>, %arg4: memref<1x128xf32, #tpu.memory_space<vmem>>, %arg5: memref<128x128xbf16, #tpu.memory_space<vmem>>, %arg6: memref<1x128xf32, #tpu.memory_space<vmem>>, %arg7: memref<16x128xf32, #tpu.memory_space<vmem>>, %arg8: memref<16x128xf32, #tpu.memory_space<vmem>>) attributes {dimension_semantics = [#tpu.dimension_semantics<parallel>, #tpu.dimension_semantics<arbitrary>], iteration_bounds = array<i64: 1, 1>, scalar_prefetch = 0 : i64, scratch_operands = 1 : i64, tpu.core_type = #tpu.core_type<tc>, window_params = [{transform_indices = @transform_0, window_bounds = array<i64: 16, 128>}, {transform_indices = @transform_1, window_bounds = array<i64: 128, 128>}, {transform_indices = @transform_2, window_bounds = array<i64: 1, 128>}, {transform_indices = @transform_3, window_bounds = array<i64: 128, 128>}, {pipeline_mode = #tpu.pipeline_mode<synchronous>, transform_indices = @transform_4, window_bounds = array<i64: 1, 128>}, {transform_indices = @transform_5, window_bounds = array<i64: 16, 128>}]} {
    %c0_i32 = arith.constant 0 : i32
    %0 = arith.cmpi eq, %arg1, %c0_i32 : i32
    %1 = arith.extui %0 : i1 to i32
    %c0_i32_0 = arith.constant 0 : i32
    %2 = arith.cmpi ne, %1, %c0_i32_0 : i32
    scf.if %2 {
      %c0_16 = arith.constant 0 : index
      %c0_17 = arith.constant 0 : index
      %20 = vector.load %arg6[%c0_16, %c0_17] : memref<1x128xf32, #tpu.memory_space<vmem>>, vector<1x128xf32>
      %21 = vector.shape_cast %20 : vector<1x128xf32> to vector<1x128xf32>
      %22 = vector.broadcast %21 : vector<1x128xf32> to vector<16x128xf32>
      %c0_18 = arith.constant 0 : index
      %c0_19 = arith.constant 0 : index
      %23 = vector.load %arg8[%c0_18, %c0_19] : memref<16x128xf32, #tpu.memory_space<vmem>>, vector<16x128xf32>
      tpu.vector_store %arg8[%c0_18, %c0_19], %22 {strides = array<i32>} : memref<16x128xf32, #tpu.memory_space<vmem>>, vector<16x128xf32>,
    } else {
    }
    %c0 = arith.constant 0 : index
    %c0_1 = arith.constant 0 : index
    %3 = vector.load %arg2[%c0, %c0_1] : memref<16x128xbf16, #tpu.memory_space<vmem>>, vector<16x128xbf16>
    %c0_2 = arith.constant 0 : index
    %c0_3 = arith.constant 0 : index
    %4 = vector.load %arg3[%c0_2, %c0_3] : memref<128x128xbf16, #tpu.memory_space<vmem>>, vector<128x128xbf16>
    %cst = arith.constant dense<0.000000e+00> : vector<16x128xf32>
    %5 = tpu.matmul %3, %4, %cst {dimension_numbers = #tpu.dot_dimension_numbers<[1], [0], [0], [1], [0, 0, 1, 1], [], []>} : vector<16x128xbf16>, vector<128x128xbf16>, vector<16x128xf32> -> vector<16x128xf32>
    %c0_4 = arith.constant 0 : index
    %c0_5 = arith.constant 0 : index
    %6 = vector.load %arg4[%c0_4, %c0_5] : memref<1x128xf32, #tpu.memory_space<vmem>>, vector<1x128xf32>
    %7 = vector.broadcast %6 : vector<1x128xf32> to vector<16x128xf32>
    %8 = arith.addf %5, %7 : vector<16x128xf32>
    %cst_6 = arith.constant 0.000000e+00 : f32
    %9 = vector.broadcast %cst_6 : f32 to vector<16x128xf32>
    %10 = arith.maximumf %8, %9 : vector<16x128xf32>
    %c0_7 = arith.constant 0 : index
    %c0_8 = arith.constant 0 : index
    %11 = vector.load %arg8[%c0_7, %c0_8] : memref<16x128xf32, #tpu.memory_space<vmem>>, vector<16x128xf32>
    %12 = arith.truncf %10 : vector<16x128xf32> to vector<16x128xbf16>
    %c0_9 = arith.constant 0 : index
    %c0_10 = arith.constant 0 : index
    %13 = vector.load %arg5[%c0_9, %c0_10] : memref<128x128xbf16, #tpu.memory_space<vmem>>, vector<128x128xbf16>
    %cst_11 = arith.constant dense<0.000000e+00> : vector<16x128xf32>
    %14 = tpu.matmul %12, %13, %cst_11 {dimension_numbers = #tpu.dot_dimension_numbers<[1], [0], [0], [1], [0, 0, 1, 1], [], []>} : vector<16x128xbf16>, vector<128x128xbf16>, vector<16x128xf32> -> vector<16x128xf32>
    %15 = arith.addf %11, %14 : vector<16x128xf32>
    %c0_12 = arith.constant 0 : index
    %c0_13 = arith.constant 0 : index
    %16 = vector.load %arg8[%c0_12, %c0_13] : memref<16x128xf32, #tpu.memory_space<vmem>>, vector<16x128xf32>
    tpu.vector_store %arg8[%c0_12, %c0_13], %15 {strides = array<i32>} : memref<16x128xf32, #tpu.memory_space<vmem>>, vector<16x128xf32>,
    %c0_i32_14 = arith.constant 0 : i32
    %17 = arith.cmpi eq, %arg1, %c0_i32_14 : i32
    %18 = arith.extui %17 : i1 to i32
    %c0_i32_15 = arith.constant 0 : i32
    %19 = arith.cmpi ne, %18, %c0_i32_15 : i32
    scf.if %19 {
      %c0_16 = arith.constant 0 : index
      %c0_17 = arith.constant 0 : index
      %20 = vector.load %arg8[%c0_16, %c0_17] : memref<16x128xf32, #tpu.memory_space<vmem>>, vector<16x128xf32>
      %c0_18 = arith.constant 0 : index
      %c0_19 = arith.constant 0 : index
      %21 = vector.load %arg7[%c0_18, %c0_19] : memref<16x128xf32, #tpu.memory_space<vmem>>, vector<16x128xf32>
      tpu.vector_store %arg7[%c0_18, %c0_19], %20 {strides = array<i32>} : memref<16x128xf32, #tpu.memory_space<vmem>>, vector<16x128xf32>,
    } else {
    }
    return
  }
  func.func @transform_0(%arg0: i32, %arg1: i32) -> (i32, i32) {
    %c0_i32 = arith.constant 0 : i32
    %c0_i32_0 = arith.constant 0 : i32
    return %arg0, %c0_i32 : i32, i32
  }
  func.func @transform_1(%arg0: i32, %arg1: i32) -> (i32, i32) {
    %c0_i32 = arith.constant 0 : i32
    %c0_i32_0 = arith.constant 0 : i32
    return %c0_i32, %arg1 : i32, i32
  }
  func.func @transform_2(%arg0: i32, %arg1: i32) -> (i32, i32) {
    %c0_i32 = arith.constant 0 : i32
    %c0_i32_0 = arith.constant 0 : i32
    return %c0_i32, %arg1 : i32, i32
  }
  func.func @transform_3(%arg0: i32, %arg1: i32) -> (i32, i32) {
    %c0_i32 = arith.constant 0 : i32
    %c0_i32_0 = arith.constant 0 : i32
    return %arg1, %c0_i32 : i32, i32
  }
  func.func @transform_4(%arg0: i32, %arg1: i32) -> (i32, i32) {
    %c0_i32 = arith.constant 0 : i32
    %c0_i32_0 = arith.constant 0 : i32
    %c0_i32_1 = arith.constant 0 : i32
    return %c0_i32, %c0_i32_0 : i32, i32
  }
  func.func @transform_5(%arg0: i32, %arg1: i32) -> (i32, i32) {
    %c0_i32 = arith.constant 0 : i32
    %c0_i32_0 = arith.constant 0 : i32
    return %arg0, %c0_i32 : i32, i32
  }
}

</mosaic_0001>

<bundles_post_ra>
// kernel: feed_forward.1
= control target key start
LH: loop header
LB: loop body
LE: loop exit
PB: predicated region body
PF: predicated region fallthrough
CT: control target
= control target key end

     0   :  { %v375_v0 = vmov 0.0   ;;  %vm376_vm0 = vmmov 0   ;;  %s470_s1 = inlined_call_operand.vmem [shape: bf16[128,128], index: 1, kind: input, shape index: {}]   ;;  %s471_s3 = inlined_call_operand.vmem [shape: bf16[128,128], index: 3, kind: input, shape index: {}]   ;;  %s472_s0 = inlined_call_operand.vmem [shape: bf16[16,128], index: 0, kind: input, shape index: {}]   ;;  %s473_s2 = inlined_call_operand.vmem [shape: f32[1,128], index: 2, kind: input, shape index: {}]   ;;  %s474_s4 = inlined_call_operand.vmem [shape: f32[1,128], index: 4, kind: input, shape index: {}]   ;;  %s475_s5 = inlined_call_operand.vmem [shape: f32[16,128], index: 5, kind: output, shape index: {}]  }
   0x1   :  { %316 = vmatprep.subr.bf16.mxu0 %v375_v0  ;;  %v358_v1 = vld [vmem:[%s470_s1 + $0x38] sm:$0xff]   ;;  %332 = vmatprep.mubr.msk.bf16.mxu0 %vm376_vm0, %v375_v0  ;;  %v359_v2 = vld [vmem:[%s470_s1 + $0x30] sm:$0xff]   ;;  %v360_v3 = vld [vmem:[%s470_s1 + $0x28] sm:$0xff]  }
   0x2   :  { %336 = vmatprep.subr.bf16.mxu1 %v375_v0  ;;  %352 = vmatprep.mubr.msk.bf16.mxu1 %vm376_vm0, %v375_v0  ;;  %v367_v4 = vld [vmem:[%s471_s3 + $0x38] sm:$0xff]   ;;  %v361_v5 = vld [vmem:[%s470_s1 + $0x20] sm:$0xff]   ;;  %v368_v6 = vld [vmem:[%s471_s3 + $0x30] sm:$0xff]  }
   0x3   :  { %317 = vmatpush3.bf16.msra.mxu0 %v358_v1  ;;  %337 = vmatpush3.bf16.msra.mxu1 %v367_v4  ;;  %v362_v7 = vld [vmem:[%s470_s1 + $0x18] sm:$0xff]   ;;  %v369_v8 = vld [vmem:[%s471_s3 + $0x28] sm:$0xff]   ;;  %v363_v9 = vld [vmem:[%s470_s1 + $0x10] sm:$0xff]  }
   0x4   :  { %318 = vmatprep.subr.bf16.mxu0 %v375_v0  ;;  %338 = vmatprep.subr.bf16.mxu1 %v375_v0  ;;  %v370_v10 = vld [vmem:[%s471_s3 + $0x20] sm:$0xff]   ;;  %v364_v11 = vld [vmem:[%s470_s1 + $0x8] sm:$0xff]   ;;  %v371_v12 = vld [vmem:[%s471_s3 + $0x18] sm:$0xff]  }
   0x5   :  { %v365_v13 = vld [vmem:[%s470_s1] sm:$0xff]   ;;  %v372_v15 = vld [vmem:[%s471_s3 + $0x10] sm:$0xff]   ;;  %v373_v16 = vld [vmem:[%s471_s3 + $0x8] sm:$0xff]  }
   0x6   :  { %v366_v14 = vld [vmem:[%s472_s0] sm:$0xff]  }
   0x7   :  { %319 = vmatpush3.bf16.msra.mxu0 %v359_v2  ;;  %339 = vmatpush3.bf16.msra.mxu1 %v368_v6  ;;  %v374_v17 = vld [vmem:[%s471_s3] sm:$0xff]  }
   0x8   :  { %320 = vmatprep.subr.bf16.mxu0 %v375_v0  ;;  %340 = vmatprep.subr.bf16.mxu1 %v375_v0  ;;  %v280_v18 = vld [vmem:[%s473_s2] ss:$0 sm:$0xff] }
   0x9   :  { %v279_v28 = vld [vmem:[%s474_s4] ss:$0 sm:$0xff] }
   0xb   :  { %321 = vmatpush3.bf16.msra.mxu0 %v360_v3  ;;  %341 = vmatpush3.bf16.msra.mxu1 %v369_v8 }
   0xc   :  { %322 = vmatprep.subr.bf16.mxu0 %v375_v0  ;;  %342 = vmatprep.subr.bf16.mxu1 %v375_v0 }
   0xf   :  { %323 = vmatpush3.bf16.msra.mxu0 %v361_v5  ;;  %343 = vmatpush3.bf16.msra.mxu1 %v370_v10 }
  0x10   :  { %324 = vmatprep.subr.bf16.mxu0 %v375_v0  ;;  %344 = vmatprep.subr.bf16.mxu1 %v375_v0 }
  0x13   :  { %325 = vmatpush3.bf16.msra.mxu0 %v362_v7  ;;  %345 = vmatpush3.bf16.msra.mxu1 %v371_v12 }
  0x14   :  { %326 = vmatprep.subr.bf16.mxu0 %v375_v0  ;;  %346 = vmatprep.subr.bf16.mxu1 %v375_v0 }
  0x17   :  { %327 = vmatpush3.bf16.msra.mxu0 %v363_v9  ;;  %347 = vmatpush3.bf16.msra.mxu1 %v372_v15 }
  0x18   :  { %328 = vmatprep.subr.bf16.mxu0 %v375_v0  ;;  %348 = vmatprep.subr.bf16.mxu1 %v375_v0 }
  0x1b   :  { %329 = vmatpush3.bf16.msra.mxu0 %v364_v11  ;;  %349 = vmatpush3.bf16.msra.mxu1 %v373_v16 }
  0x1c   :  { %330 = vmatprep.subr.bf16.mxu0 %v375_v0  ;;  %350 = vmatprep.subr.bf16.mxu1 %v375_v0 }
  0x1f   :  { %331 = vmatpush3.bf16.msra.mxu0 %v365_v13  ;;  %351 = vmatpush3.bf16.msra.mxu1 %v374_v17 }
  0x22   :  { %333 = vmatmul.mubr.bf16.vlgmr.msra.gmra.mxu0 %v366_v14 }
  0xe2   :  { %v147_v19 = vpop.f32.mrf.mxu0 }
  0xe3   :  { %v148_v21 = vadd.f32 %v280_v18, %v147_v19 }
  0xe4   :  { %v334_v20 = vpop.f32.mrf.mxu0 }
  0xe5   :  { %v154_v25 = vmax.f32 %v148_v21, 0.0 }
  0xe6   :  { %v150_v22 = vpop.f32.mrf.mxu0 }
  0xe7   :  { %v151_v23 = vadd.f32 %v280_v18, %v150_v22 }
  0xe8   :  { %v335_v24 = vpop.f32.mrf.mxu0 }
  0xe9   :  { %v155_v26 = vmax.f32 %v151_v23, 0.0 }
  0xeb   :  { %v158_v27 = vpack.c.bf16 %v155_v26, %v154_v25 }
  0xed   :  { %353 = vmatmul.mubr.bf16.vlgmr.msra.gmra.mxu1 %v158_v27 }
 0x1ad   :  { %v257_v29 = vpop.f32.mrf.mxu1 }
 0x1ae   :  { %v264_v30 = vadd.f32 %v279_v28, %v257_v29 }
 0x1af   :  { %v354_v31 = vpop.f32.mrf.mxu1 }
 0x1b0   :  { %273 = vst [vmem:[%s475_s5] sm:$0xff] %v264_v30 }
 0x1b1   :  { %v260_v32 = vpop.f32.mrf.mxu1 }
 0x1b2   :  { %v265_v33 = vadd.f32 %v279_v28, %v260_v32 }
 0x1b3   :  { %v355_v34 = vpop.f32.mrf.mxu1 }
 0x1b4   :  { %274 = vst [vmem:[%s475_s5 + $0x8] sm:$0xff] %v265_v33 }

</bundles_post_ra>
